<compile_context>
chip_gen: v6e
topology: v6e:2x2x1
jax: 0.10.0
libtpu: 0.0.40
codegen_flags: <defaults>
</compile_context>

<pallas_src>
import jax
import jax.numpy as jnp
from jax.experimental import pallas as pl
from jax.experimental.pallas import tpu as pltpu


_MAX_DMA_CHUNKS = 4          # parallel DMA streams (start all, wait all)
_MIN_CHUNK_BYTES = 1 << 20   # do not split a copy below ~1 MiB per DMA


def _leading_dim_chunks(shape, itemsize):
    """Static (start, size) splits of the leading dim, or None for whole-array.

    Splitting only the leading (major) dim keeps every DMA aligned to the
    minor (8, 128) tiling regardless of dtype, and any split of a major dim is
    legal for an HBM ref.
    """
    if len(shape) < 2:
        return None
    lead = shape[0]
    total_bytes = itemsize
    for d in shape:
        total_bytes *= d
    n = min(_MAX_DMA_CHUNKS, lead, max(1, total_bytes // _MIN_CHUNK_BYTES))
    if n <= 1:
        return None
    base = -(-lead // n)  # ceil-div chunk size along the leading dim
    chunks = []
    start = 0
    while start < lead:
        size = min(base, lead - start)
        chunks.append((start, size))
        start += size
    return chunks if len(chunks) > 1 else None


def _make_hbm_copy_kernel(chunks):
    """Kernel body: chunked HBM->HBM DMA copy, no VMEM round trip."""

    def kernel(x_hbm, o_hbm, sems):
        if chunks is None:
            descs = [pltpu.make_async_copy(x_hbm, o_hbm, sems.at[0])]
        else:
            descs = [
                pltpu.make_async_copy(
                    x_hbm.at[pl.ds(start, size)],
                    o_hbm.at[pl.ds(start, size)],
                    sems.at[i],
                )
                for i, (start, size) in enumerate(chunks)
            ]
        for d in descs:   # issue every DMA before waiting on any of them
            d.start()
        for d in descs:
            d.wait()

    return kernel


def _hbm_copy(x: jax.Array) -> jax.Array:
    """Fresh-buffer copy of `x` via direct HBM->HBM DMA (no VMEM staging)."""
    itemsize = jnp.dtype(x.dtype).itemsize
    chunks = _leading_dim_chunks(x.shape, itemsize)
    n_sems = 1 if chunks is None else len(chunks)
    nbytes = itemsize
    for d in x.shape:
        nbytes *= d
    return pl.pallas_call(
        _make_hbm_copy_kernel(chunks),
        out_shape=jax.ShapeDtypeStruct(x.shape, x.dtype),
        in_specs=[pl.BlockSpec(memory_space=pl.ANY)],
        out_specs=pl.BlockSpec(memory_space=pl.ANY),
        scratch_shapes=[pltpu.SemaphoreType.DMA((n_sems,))],
        cost_estimate=pl.CostEstimate(
            flops=0, transcendentals=0, bytes_accessed=2 * nbytes
        ),
    )(x)


def op_forward(x: jax.Array, *, copy: bool = False) -> jax.Array:
    """Pallas translation of Op.forward (in-place identity pass-through).

    The reference Op applies operations in place, so the identity output
    aliases the input: with copy=False we short-circuit at the JAX level
    (zero HBM traffic).  With copy=True a fresh buffer is produced by the
    chunked HBM->HBM DMA kernel above.
    """
    if not copy:
        return x
    if x.ndim == 0 or x.size == 0:
        # Degenerate shapes: not worth a kernel launch.
        return jnp.copy(x)
    return _hbm_copy(x)


if __name__ == "__main__":
    key = jax.random.PRNGKey(0)
    k1, k2, k3 = jax.random.split(key, 3)

    # Small NCHW pipeline input: batch=2, C=4, 16x16 (PyTorch convention).
    x = jax.random.normal(k1, (2, 4, 16, 16), dtype=jnp.float32)

    # 1) Identity semantics of Op.forward: zero-copy short-circuit.
    y_id = op_forward(x)
    assert y_id is x

    # 2) Fresh-buffer request: whole-array HBM->HBM DMA copy kernel.
    y = op_forward(x, copy=True)
    jax.block_until_ready(y)
    assert y.shape == x.shape and y.dtype == x.dtype
    assert bool(jnp.array_equal(y, x)), "identity copy mismatch"

    # 3) Ragged element count (not a multiple of 128 lanes): same whole-array
    #    DMA path -- no pad / slice round trips.
    x_ragged = jax.random.normal(k2, (2, 3, 7, 5), dtype=jnp.float32)
    y_ragged = op_forward(x_ragged, copy=True)
    jax.block_until_ready(y_ragged)
    assert bool(jnp.array_equal(y_ragged, x_ragged)), "ragged copy mismatch"

    # 4) Tensor large enough to exercise the chunked (multi-DMA-stream) path:
    #    2 MiB -> two 1 MiB DMAs split along the batch dim.
    x_big = jax.random.normal(k3, (8, 4, 128, 128), dtype=jnp.float32)
    y_big = op_forward(x_big, copy=True)
    jax.block_until_ready(y_big)
    assert bool(jnp.array_equal(y_big, x_big)), "chunked copy mismatch"

    print("KERNEL_OK")
</pallas_src>

<mosaic_0001>
module attributes {stable_mosaic.version = 11 : i64} {
  func.func @kernel(%arg0: memref<2x4x16x16xf32, #tpu.memory_space<any>>, %arg1: memref<2x4x16x16xf32, #tpu.memory_space<any>>, %arg2: memref<1x!tpu.dma_semaphore, #tpu.memory_space<semaphore_mem>>) attributes {dimension_semantics = [], scalar_prefetch = 0 : i64, scratch_operands = 1 : i64, tpu.core_type = #tpu.core_type<tc>} {
    %c0_i32 = arith.constant 0 : i32
    %0 = tpu.memref_slice %arg2[%c0_i32] : memref<1x!tpu.dma_semaphore, #tpu.memory_space<semaphore_mem>> -> memref<1x!tpu.dma_semaphore, #tpu.memory_space<semaphore_mem>>
    %1 = tpu.memref_squeeze %0 : memref<1x!tpu.dma_semaphore, #tpu.memory_space<semaphore_mem>> -> memref<!tpu.dma_semaphore, #tpu.memory_space<semaphore_mem>>
    tpu.enqueue_dma source(%arg0 : memref<2x4x16x16xf32, #tpu.memory_space<any>>) target(%arg1 : memref<2x4x16x16xf32, #tpu.memory_space<any>>) target_semaphore(%1 : memref<!tpu.dma_semaphore, #tpu.memory_space<semaphore_mem>>)
    %c0_i32_0 = arith.constant 0 : i32
    %2 = tpu.memref_slice %arg2[%c0_i32_0] : memref<1x!tpu.dma_semaphore, #tpu.memory_space<semaphore_mem>> -> memref<1x!tpu.dma_semaphore, #tpu.memory_space<semaphore_mem>>
    %3 = tpu.memref_squeeze %2 : memref<1x!tpu.dma_semaphore, #tpu.memory_space<semaphore_mem>> -> memref<!tpu.dma_semaphore, #tpu.memory_space<semaphore_mem>>
    tpu.wait_dma2 semaphore(%3 : memref<!tpu.dma_semaphore, #tpu.memory_space<semaphore_mem>>) src(%arg0 : memref<2x4x16x16xf32, #tpu.memory_space<any>>) dst(%arg1 : memref<2x4x16x16xf32, #tpu.memory_space<any>>)
    return
  }
}

</mosaic_0001>

<bundles_post_ra>
// kernel: tpu_custom_call.1
= control target key start
LH: loop header
LB: loop body
LE: loop exit
PB: predicated region body
PF: predicated region fallthrough
CT: control target
= control target key end

     0   :  { %s30_s6 = smov [#allocation2]   ;;  %s31_s7 = smov 131072   ;;  %s49_s0 = inlined_call_operand.hbm [shape: f32[2,4,16,16], index: 0, kind: input, shape index: {}]   ;;  %s50_s1 = inlined_call_operand.hbm [shape: f32[2,4,16,16], index: 1, kind: output, shape index: {}]  }
   0x1   :  { %s32_s8 = smov 0  }
   0x2   :  { %12 = dma.general %s49_s0, 2048, %s50_s1, %s30_s6, %s31_s7, [#allocation4], %s32_s8, 0  }
   0x3   :  { %28 = dma.done.wait [#allocation2], 2048 }
   0x4   :  { %29 = vsyncadd [#allocation2], 4294965248 }
   0x5   :  { %18 = vsyncmov [#allocation2] }
   0x8   :  { %s19_s13 = vpop.sfrf %18 }
   0x9   :  { %p24_p0 = scmp.ne.s32.totalorder %s19_s13, 0 }
   0xb   :  { %23 = shalt.err (%p24_p0)  }

</bundles_post_ra>
